<compile_context>
chip_gen: v7x
topology: tpu7x:2x2x1
jax: 0.10.0
libtpu: 0.0.40
codegen_flags: <defaults>
</compile_context>

<pallas_src>
import functools

import jax
import jax.numpy as jnp
from jax.experimental import pallas as pl
from jax.experimental.pallas import tpu as pltpu

LANE = 128
TARGET_STEP_BYTES = 2 << 20        # aim for ~2 MB of HBM traffic per grid step
FOLD_THRESHOLD_BYTES = 256 << 10   # fold batch onto lanes only below this per-step traffic
MIN_SPLIT_BYTES = 1 << 20          # above this total traffic, insist on >= 2 grid steps (v7x: 2 TCs)


def lfq_kernel(z_ref, w_in_ref, b_in_ref, w_out_ref, b_out_ref, pow2_ref,
               zq_ref, ze_ref, idx_ref):
    """One lane-tile of the LFQ forward.

    z_ref    : (C_in, Tt)   input slab (channels on sublanes, time/batch on lanes)
    w_in_ref : (D, C_in)    b_in_ref : (D, 1)
    w_out_ref: (C_in, D)    b_out_ref: (C_in, 1)
    pow2_ref : (1, D)       f32 row of 2**d for the MXU-based index computation
    outputs  : zq (C_in, Tt), ze (D, Tt), idx (1, Tt) int32
    """
    z = z_ref[...]

    # in_project (1x1 weight-normed conv == channel matmul) + sigmoid.
    # For bit-exact parity with a full-f32 PyTorch reference near the 0.5 rounding
    # threshold, precision=jax.lax.Precision.HIGHEST could be passed here; the
    # kernel is HBM-bound either way.
    pre = jnp.dot(w_in_ref[...], z, preferred_element_type=jnp.float32) + b_in_ref[...]
    z_e = jax.nn.sigmoid(pre)

    # straight-through round (forward value only)
    z_round = jnp.round(z_e)

    # out_project (1x1 conv)
    z_q = jnp.dot(w_out_ref[...], z_round,
                  preferred_element_type=jnp.float32) + b_out_ref[...]

    zq_ref[...] = z_q.astype(zq_ref.dtype)
    ze_ref[...] = z_e.astype(ze_ref.dtype)

    # indices = sum_d round(z_e)[d] * 2**d  -- on the MXU (exact for D <= 24).
    # TODO(synk): PyTorch returns int64 indices; TPU kernel emits int32 (codebook fits easily).
    idx = jnp.dot(pow2_ref[...], z_round, preferred_element_type=jnp.float32)
    idx_ref[...] = idx.astype(jnp.int32)


def _weight_norm(v, g):
    # v: (out_ch, in_ch) (kernel_size=1 squeezed), g: (out_ch,)
    norm = jnp.sqrt(jnp.sum(v * v, axis=1, keepdims=True))
    return v * (g[:, None] / norm)


def _round_up(n, m):
    return ((n + m - 1) // m) * m


def _hbm_bytes_per_col(c_in, d, out_bytes):
    # read z (f32) + write z_q, z_e (out_dtype) + write idx (int32), per lane column.
    return 4 * c_in + out_bytes * (c_in + d) + 4


def _vmem_and_tile_cap(c_in, d, out_bytes):
    """(vmem_limit_bytes to request, largest lane tile that fits the budget)."""
    try:
        cap = int(pltpu.get_tpu_info().vmem_capacity_bytes)
    except Exception:
        cap = 64 << 20  # assume the smallest (v7x per-core) physical VMEM
    budget = int(min(cap // 2, 48 << 20))
    # VMEM bytes per lane column:
    #   double-buffered input block:    2 * 4 * c_in
    #   double-buffered output blocks:  2 * (out_bytes*(c_in+d) + 4)
    #   live f32 intermediates:         4 * (c_in + 3*d + 1)   (pre/z_e/z_round + z_q + idx)
    per_col = (2 * 4 * c_in
               + 2 * (out_bytes * (c_in + d) + 4)
               + 4 * (c_in + 3 * d + 1))
    fixed = 2 * 4 * (2 * c_in * d + c_in + 3 * d)  # weights / biases / pow2 (double-buffered)
    avail = int(budget * 0.6) - fixed
    tile_cap = max(LANE, (max(avail, per_col * LANE) // per_col) // LANE * LANE)
    # 128 MiB parts (v5e/v6e) can take much larger lane tiles; keep v7x (64 MiB) tighter.
    max_tile = 16384 if cap >= (100 << 20) else 8192
    return budget, int(min(tile_cap, max_tile))


def _pick_tile(n_cols, hbm_per_col, tile_cap):
    """Lane tile (multiple of 128) targeting ~TARGET_STEP_BYTES of HBM traffic per step."""
    target = _round_up(max(1, TARGET_STEP_BYTES // hbm_per_col), LANE)
    tile = max(LANE, min(tile_cap, target))
    return int(min(tile, _round_up(n_cols, LANE)))


@functools.partial(jax.jit, static_argnames=("codebook_dim", "out_dtype"))
def lookup_free_quantize(z, params, codebook_dim, out_dtype=jnp.float32):
    """z: (B, input_dim, T) float32.  Returns (z_q, commit_loss, codebook_loss, indices, z_e)."""
    B, C_in, T = z.shape
    D = codebook_dim
    assert D <= 24, "f32 MXU index computation is exact only for codebook_dim <= 24"
    # TODO(synk): the PyTorch module uses nn.Identity when input_dim == codebook_dim;
    # this wrapper always takes the weight-normed 1x1 conv path.

    w_in = _weight_norm(params["in_v"], params["in_g"])          # (D, C_in)
    b_in = params["in_b"].reshape(D, 1)                          # (D, 1)
    w_out = _weight_norm(params["out_v"], params["out_g"])       # (C_in, D)
    b_out = params["out_b"].reshape(C_in, 1)                     # (C_in, 1)
    pow2 = (2.0 ** jnp.arange(D, dtype=jnp.float32)).reshape(1, D)

    out_bytes = jnp.dtype(out_dtype).itemsize
    hbm_per_col = _hbm_bytes_per_col(C_in, D, out_bytes)
    budget, tile_cap = _vmem_and_tile_cap(C_in, D, out_bytes)
    cparams_kw = dict(vmem_limit_bytes=budget)

    # Traffic one per-batch grid step could move without folding batch onto lanes.
    per_batch_step_bytes = min(_round_up(T, LANE), tile_cap) * hbm_per_col
    use_fold = (B > 1) and (per_batch_step_bytes < FOLD_THRESHOLD_BYTES)

    if not use_fold:
        # ---- Path A: original (B, C_in, T) layout; grid=(B, cdiv(T, t_tile)). ----
        # No wrapper transposes / padding: the ragged tail tile is handled by Pallas
        # (out-of-bounds columns are never written back).
        t_tile = _pick_tile(T, hbm_per_col, tile_cap)
        nT = pl.cdiv(T, t_tile)
        if B * nT < 2 and B * T * hbm_per_col > MIN_SPLIT_BYTES:
            # Non-trivial work on a 1x1 grid would pin everything to one TensorCore (v7x).
            t_tile = max(LANE, _round_up(pl.cdiv(T, 2), LANE))
            nT = pl.cdiv(T, t_tile)
        grid = (B, nT)
        wmap = lambda b, t: (0, 0)
        z_q, z_e, idx = pl.pallas_call(
            lfq_kernel,
            out_shape=(
                jax.ShapeDtypeStruct((B, C_in, T), out_dtype),
                jax.ShapeDtypeStruct((B, D, T), out_dtype),
                jax.ShapeDtypeStruct((B, 1, T), jnp.int32),
            ),
            grid=grid,
            in_specs=[
                pl.BlockSpec((None, C_in, t_tile), lambda b, t: (b, 0, t)),
                pl.BlockSpec((D, C_in), wmap),
                pl.BlockSpec((D, 1), wmap),
                pl.BlockSpec((C_in, D), wmap),
                pl.BlockSpec((C_in, 1), wmap),
                pl.BlockSpec((1, D), wmap),
            ],
            out_specs=(
                pl.BlockSpec((None, C_in, t_tile), lambda b, t: (b, 0, t)),
                pl.BlockSpec((None, D, t_tile), lambda b, t: (b, 0, t)),
                pl.BlockSpec((None, 1, t_tile), lambda b, t: (b, 0, t)),
            ),
            compiler_params=pltpu.CompilerParams(
                dimension_semantics=("parallel", "parallel"), **cparams_kw),
        )(z, w_in, b_in, w_out, b_out, pow2)
        indices = idx[:, 0, :]                                   # (B, T)
    else:
        # ---- Path B: per-batch steps would be tiny -> fold batch onto the lane axis. ----
        # The wrapper transpose passes are cheap here because this path is only taken
        # when each per-batch step would move < FOLD_THRESHOLD_BYTES of HBM traffic.
        N = B * T
        z2 = jnp.transpose(z, (1, 0, 2)).reshape(C_in, N)        # (C_in, B*T)
        n_pad = max(_round_up(N, LANE), LANE)                    # pad to a 128 multiple only
        if n_pad != N:
            z2 = jnp.pad(z2, ((0, 0), (0, n_pad - N)))
        tile = _pick_tile(n_pad, hbm_per_col, tile_cap)
        grid = (pl.cdiv(n_pad, tile),)
        wmap1 = lambda t: (0, 0)
        zq2, ze2, idx2 = pl.pallas_call(
            lfq_kernel,
            out_shape=(
                jax.ShapeDtypeStruct((C_in, n_pad), out_dtype),
                jax.ShapeDtypeStruct((D, n_pad), out_dtype),
                jax.ShapeDtypeStruct((1, n_pad), jnp.int32),
            ),
            grid=grid,
            in_specs=[
                pl.BlockSpec((C_in, tile), lambda t: (0, t)),
                pl.BlockSpec((D, C_in), wmap1),
                pl.BlockSpec((D, 1), wmap1),
                pl.BlockSpec((C_in, D), wmap1),
                pl.BlockSpec((C_in, 1), wmap1),
                pl.BlockSpec((1, D), wmap1),
            ],
            out_specs=(
                pl.BlockSpec((C_in, tile), lambda t: (0, t)),
                pl.BlockSpec((D, tile), lambda t: (0, t)),
                pl.BlockSpec((1, tile), lambda t: (0, t)),
            ),
            compiler_params=pltpu.CompilerParams(
                dimension_semantics=("parallel",), **cparams_kw),
        )(z2, w_in, b_in, w_out, b_out, pow2)
        z_q = jnp.transpose(zq2[:, :N].reshape(C_in, B, T), (1, 0, 2))
        z_e = jnp.transpose(ze2[:, :N].reshape(D, B, T), (1, 0, 2))
        indices = idx2[0, :N].reshape(B, T)

    commit_loss = jnp.zeros((B,), dtype=jnp.float32)
    codebook_loss = jnp.zeros((B,), dtype=jnp.float32)
    return z_q, commit_loss, codebook_loss, indices, z_e


def init_params(key, input_dim, codebook_dim):
    k = jax.random.split(key, 6)
    # weight_norm(Conv1d) parameters: v (out,in,1)->(out,in), g (out,), bias (out,)
    in_v = jax.random.normal(k[0], (codebook_dim, input_dim), jnp.float32) * 0.5
    in_g = 1.0 + 0.1 * jax.random.normal(k[1], (codebook_dim,), jnp.float32)
    in_b = 0.1 * jax.random.normal(k[2], (codebook_dim,), jnp.float32)
    out_v = jax.random.normal(k[3], (input_dim, codebook_dim), jnp.float32) * 0.5
    out_g = 1.0 + 0.1 * jax.random.normal(k[4], (input_dim,), jnp.float32)
    out_b = 0.1 * jax.random.normal(k[5], (input_dim,), jnp.float32)
    return dict(in_v=in_v, in_g=in_g, in_b=in_b,
                out_v=out_v, out_g=out_g, out_b=out_b)


def _check(z, params, codebook_dim, outs):
    z_q, commit_loss, codebook_loss, indices, z_e = outs
    w_in = _weight_norm(params["in_v"], params["in_g"])
    w_out = _weight_norm(params["out_v"], params["out_g"])
    ze_ref = jax.nn.sigmoid(jnp.einsum("dc,bct->bdt", w_in, z)
                            + params["in_b"][None, :, None])
    assert jnp.allclose(z_e, ze_ref, atol=1e-4), "z_e mismatch"
    # Check out_project + indices against the kernel's own z_e (avoids flakiness
    # when a sigmoid output lands within float noise of 0.5).
    z_round = jnp.round(z_e)
    zq_ref = (jnp.einsum("cd,bdt->bct", w_out, z_round)
              + params["out_b"][None, :, None])
    assert jnp.allclose(z_q, zq_ref, atol=1e-4), "z_q mismatch"
    bits = (2 ** jnp.arange(codebook_dim, dtype=jnp.int32))[None, :, None]
    idx_ref = jnp.sum(z_round.astype(jnp.int32) * bits, axis=1)
    assert jnp.array_equal(indices, idx_ref), "indices mismatch"
    assert commit_loss.shape == (z.shape[0],)
    assert codebook_loss.shape == (z.shape[0],)


if __name__ == "__main__":
    input_dim = 8
    codebook_dim = 4          # codebook_size = 2**4 = 16

    key = jax.random.PRNGKey(0)
    pkey, zkey1, zkey2 = jax.random.split(key, 3)
    params = init_params(pkey, input_dim, codebook_dim)

    # Case 1: tiny per-batch T -> batch folded onto the lane axis (Path B).
    B1, T1 = 2, 16
    z1 = jax.random.normal(zkey1, (B1, input_dim, T1), jnp.float32)
    out1 = lookup_free_quantize(z1, params, codebook_dim)
    jax.block_until_ready(out1)

    # Case 2: larger, ragged T (not a multiple of 128) -> original-layout tiled
    # grid path (Path A) with a ragged tail tile; no wrapper transposes or pads.
    B2, T2 = 2, 4000
    z2 = jax.random.normal(zkey2, (B2, input_dim, T2), jnp.float32)
    out2 = lookup_free_quantize(z2, params, codebook_dim)
    jax.block_until_ready(out2)

    _check(z1, params, codebook_dim, out1)
    _check(z2, params, codebook_dim, out2)

    print("KERNEL_OK")
</pallas_src>

<mosaic_0001>
module attributes {stable_mosaic.version = 11 : i64} {
  func.func @lfq_kernel(%arg0: i32, %arg1: memref<8x128xf32, #tpu.memory_space<vmem>>, %arg2: memref<4x8xf32, #tpu.memory_space<vmem>>, %arg3: memref<4x1xf32, #tpu.memory_space<vmem>>, %arg4: memref<8x4xf32, #tpu.memory_space<vmem>>, %arg5: memref<8x1xf32, #tpu.memory_space<vmem>>, %arg6: memref<1x4xf32, #tpu.memory_space<vmem>>, %arg7: memref<8x128xf32, #tpu.memory_space<vmem>>, %arg8: memref<4x128xf32, #tpu.memory_space<vmem>>, %arg9: memref<1x128xi32, #tpu.memory_space<vmem>>) attributes {dimension_semantics = [#tpu.dimension_semantics<parallel>], iteration_bounds = array<i64: 1>, scalar_prefetch = 0 : i64, scratch_operands = 0 : i64, tpu.core_type = #tpu.core_type<tc>, window_params = [{transform_indices = @transform_0, window_bounds = array<i64: 8, 128>}, {pipeline_mode = #tpu.pipeline_mode<synchronous>, transform_indices = @transform_1, window_bounds = array<i64: 4, 8>}, {pipeline_mode = #tpu.pipeline_mode<synchronous>, transform_indices = @transform_2, window_bounds = array<i64: 4, 1>}, {pipeline_mode = #tpu.pipeline_mode<synchronous>, transform_indices = @transform_3, window_bounds = array<i64: 8, 4>}, {pipeline_mode = #tpu.pipeline_mode<synchronous>, transform_indices = @transform_4, window_bounds = array<i64: 8, 1>}, {pipeline_mode = #tpu.pipeline_mode<synchronous>, transform_indices = @transform_5, window_bounds = array<i64: 1, 4>}, {transform_indices = @transform_6, window_bounds = array<i64: 8, 128>}, {transform_indices = @transform_7, window_bounds = array<i64: 4, 128>}, {transform_indices = @transform_8, window_bounds = array<i64: 1, 128>}]} {
    %c0 = arith.constant 0 : index
    %c0_0 = arith.constant 0 : index
    %0 = vector.load %arg1[%c0, %c0_0] : memref<8x128xf32, #tpu.memory_space<vmem>>, vector<8x128xf32>
    %c0_1 = arith.constant 0 : index
    %c0_2 = arith.constant 0 : index
    %1 = vector.load %arg2[%c0_1, %c0_2] : memref<4x8xf32, #tpu.memory_space<vmem>>, vector<4x8xf32>
    %cst = arith.constant dense<0.000000e+00> : vector<4x128xf32>
    %2 = tpu.matmul %1, %0, %cst {dimension_numbers = #tpu.dot_dimension_numbers<[1], [0], [0], [1], [0, 0, 1, 1], [], []>} : vector<4x8xf32>, vector<8x128xf32>, vector<4x128xf32> -> vector<4x128xf32>
    %c0_3 = arith.constant 0 : index
    %c0_4 = arith.constant 0 : index
    %3 = vector.load %arg3[%c0_3, %c0_4] : memref<4x1xf32, #tpu.memory_space<vmem>>, vector<4x1xf32>
    %4 = vector.broadcast %3 : vector<4x1xf32> to vector<4x128xf32>
    %5 = arith.addf %2, %4 : vector<4x128xf32>
    %6 = arith.negf %5 : vector<4x128xf32>
    %7 = math.exp %6 : vector<4x128xf32>
    %cst_5 = arith.constant 1.000000e+00 : f32
    %8 = vector.broadcast %cst_5 : f32 to vector<4x128xf32>
    %9 = arith.addf %8, %7 : vector<4x128xf32>
    %10 = arith.divf %8, %9 : vector<4x128xf32>
    %11 = math.roundeven %10 : vector<4x128xf32>
    %c0_6 = arith.constant 0 : index
    %c0_7 = arith.constant 0 : index
    %12 = vector.load %arg4[%c0_6, %c0_7] : memref<8x4xf32, #tpu.memory_space<vmem>>, vector<8x4xf32>
    %cst_8 = arith.constant dense<0.000000e+00> : vector<8x128xf32>
    %13 = tpu.matmul %12, %11, %cst_8 {dimension_numbers = #tpu.dot_dimension_numbers<[1], [0], [0], [1], [0, 0, 1, 1], [], []>} : vector<8x4xf32>, vector<4x128xf32>, vector<8x128xf32> -> vector<8x128xf32>
    %c0_9 = arith.constant 0 : index
    %c0_10 = arith.constant 0 : index
    %14 = vector.load %arg5[%c0_9, %c0_10] : memref<8x1xf32, #tpu.memory_space<vmem>>, vector<8x1xf32>
    %15 = vector.broadcast %14 : vector<8x1xf32> to vector<8x128xf32>
    %16 = arith.addf %13, %15 : vector<8x128xf32>
    %c0_11 = arith.constant 0 : index
    %c0_12 = arith.constant 0 : index
    %17 = vector.load %arg7[%c0_11, %c0_12] : memref<8x128xf32, #tpu.memory_space<vmem>>, vector<8x128xf32>
    tpu.vector_store %arg7[%c0_11, %c0_12], %16 {strides = array<i32>} : memref<8x128xf32, #tpu.memory_space<vmem>>, vector<8x128xf32>,
    %c0_13 = arith.constant 0 : index
    %c0_14 = arith.constant 0 : index
    %18 = vector.load %arg8[%c0_13, %c0_14] : memref<4x128xf32, #tpu.memory_space<vmem>>, vector<4x128xf32>
    tpu.vector_store %arg8[%c0_13, %c0_14], %10 {strides = array<i32>} : memref<4x128xf32, #tpu.memory_space<vmem>>, vector<4x128xf32>,
    %c0_15 = arith.constant 0 : index
    %c0_16 = arith.constant 0 : index
    %19 = vector.load %arg6[%c0_15, %c0_16] : memref<1x4xf32, #tpu.memory_space<vmem>>, vector<1x4xf32>
    %cst_17 = arith.constant dense<0.000000e+00> : vector<1x128xf32>
    %20 = tpu.matmul %19, %11, %cst_17 {dimension_numbers = #tpu.dot_dimension_numbers<[1], [0], [0], [1], [0, 0, 1, 1], [], []>} : vector<1x4xf32>, vector<4x128xf32>, vector<1x128xf32> -> vector<1x128xf32>
    %21 = arith.fptosi %20 : vector<1x128xf32> to vector<1x128xi32>
    %c0_18 = arith.constant 0 : index
    %c0_19 = arith.constant 0 : index
    %22 = vector.load %arg9[%c0_18, %c0_19] : memref<1x128xi32, #tpu.memory_space<vmem>>, vector<1x128xi32>
    tpu.vector_store %arg9[%c0_18, %c0_19], %21 {strides = array<i32>} : memref<1x128xi32, #tpu.memory_space<vmem>>, vector<1x128xi32>,
    return
  }
  func.func @transform_0(%arg0: i32) -> (i32, i32) {
    %c0_i32 = arith.constant 0 : i32
    %c0_i32_0 = arith.constant 0 : i32
    return %c0_i32, %arg0 : i32, i32
  }
  func.func @transform_1(%arg0: i32) -> (i32, i32) {
    %c0_i32 = arith.constant 0 : i32
    %c0_i32_0 = arith.constant 0 : i32
    %c0_i32_1 = arith.constant 0 : i32
    return %c0_i32, %c0_i32_0 : i32, i32
  }
  func.func @transform_2(%arg0: i32) -> (i32, i32) {
    %c0_i32 = arith.constant 0 : i32
    %c0_i32_0 = arith.constant 0 : i32
    %c0_i32_1 = arith.constant 0 : i32
    return %c0_i32, %c0_i32_0 : i32, i32
  }
  func.func @transform_3(%arg0: i32) -> (i32, i32) {
    %c0_i32 = arith.constant 0 : i32
    %c0_i32_0 = arith.constant 0 : i32
    %c0_i32_1 = arith.constant 0 : i32
    return %c0_i32, %c0_i32_0 : i32, i32
  }
  func.func @transform_4(%arg0: i32) -> (i32, i32) {
    %c0_i32 = arith.constant 0 : i32
    %c0_i32_0 = arith.constant 0 : i32
    %c0_i32_1 = arith.constant 0 : i32
    return %c0_i32, %c0_i32_0 : i32, i32
  }
  func.func @transform_5(%arg0: i32) -> (i32, i32) {
    %c0_i32 = arith.constant 0 : i32
    %c0_i32_0 = arith.constant 0 : i32
    %c0_i32_1 = arith.constant 0 : i32
    return %c0_i32, %c0_i32_0 : i32, i32
  }
  func.func @transform_6(%arg0: i32) -> (i32, i32) {
    %c0_i32 = arith.constant 0 : i32
    %c0_i32_0 = arith.constant 0 : i32
    return %c0_i32, %arg0 : i32, i32
  }
  func.func @transform_7(%arg0: i32) -> (i32, i32) {
    %c0_i32 = arith.constant 0 : i32
    %c0_i32_0 = arith.constant 0 : i32
    return %c0_i32, %arg0 : i32, i32
  }
  func.func @transform_8(%arg0: i32) -> (i32, i32) {
    %c0_i32 = arith.constant 0 : i32
    %c0_i32_0 = arith.constant 0 : i32
    return %c0_i32, %arg0 : i32, i32
  }
}

</mosaic_0001>

<bundles_post_ra>
// kernel: squeeze.1
= control target key start
LH: loop header
LB: loop body
LE: loop exit
PB: predicated region body
PF: predicated region fallthrough
CT: control target
= control target key end

     0   :  { %s85_s0 = inlined_call_operand.vmem [shape: s32[32], index: 0, kind: input, shape index: {}]   ;;  %s86_s1 = inlined_call_operand.hbm [shape: s32[2,16], index: 1, kind: output, shape index: {}]  }
   0x1   :  { %v5_v0 = vld [vmem:[%s85_s0] sm:$0x1] }
   0x2   :  { %2 = vsyncpa [#allocation1], 0  ;;  %6 = vst [vmem:[#allocation3] sm:$0x1] %v5_v0  ;;  %vm8_vm0 = vcmask 130048   ;;  %s58_s0 = smov 112  }
   0x3   :  { %s59_s8 = smov [#allocation0]  }
   0x4   :  { %s26_s9 = sshll.u32 %s59_s8, 4  ;;  %s27_s9 = int_to_ptr.vmem [resolvable:$true] %s26_s9 }
   0x5   :  { %s34_s10 = scalar_lea.vmem %s27_s9, 32  ;;  %p39_p1 = scmp.lt.s32.totalorder %s27_s9, %s27_s9 }
   0x6   :  { %p35_p0 = scmp.ne.s32.totalorder %s27_s9, %s34_s10  ;;  %p40_p2 = scmp.lt.s32.totalorder %s34_s10, %s34_s10 }
   0x8   :  { %p41_p3 = por %p40_p2, %p39_p1 }
   0x9   :  { %v10_v1 = vld [vmem:[#allocation3] sm:$0x1]  }
   0xa   :  { %v7_v2 = vld [vmem:[#allocation3] sm:$0x1]   ;;  %11 = vrot.lane.b32.xlu0 %v10_v1, %s58_s0  ;;  %p42_p4 = pnand %p41_p3, %p35_p0 }
   0xb   :  { %9 = vst.msk [vmem:[#allocation2] sm:$0x1] %vm8_vm0, %v7_v2  }
  0x7c   :  { %v12_v3 = vpop.permute.xlu0 %11  }
  0x7d   :  { %15 = vst.msk [vmem:[#allocation2 + $0x1] sm:$0x1] %vm8_vm0, %v12_v3  }
  0x84   :  { %v19_v4 = vld [vmem:[#allocation2] sm:$0x3] }
  0x85   :  { %21 = vst [vmem:[#allocation0] sm:$0x3] %v19_v4 }
  0x86   :  { %45 = shalt.err (!%p42_p4)
}
  0x87   :  { %s46_s13 = scalar_lea.hbm %s86_s1, 32 }
  0x88   :  { %p47_p5 = scmp.ne.s32.totalorder %s86_s1, %s46_s13  ;;  %p50_p6 = scmp.lt.u32.totalorder %s46_s13, %s86_s1 }
  0x8a   :  { %p52_p7 = pnand %p50_p6, %p47_p5 }
  0x8c   :  { %55 = shalt.err (!%p52_p7)
}
  0x8d   :  { %29 = dma.vmem_to_hbm [thread:$0]  %s27_s9, 32, %s86_s1, [#allocation1]  }
  0x8e   :  { %56 = dma.done.wait [#allocation1], 32  }
  0x8f   :  { %57 = vsyncadd [#allocation1], 4294967264 }
  0x90   :  { %31 = vsyncpa [#allocation1], 1 }

// kernel: lookup_free_quantize.1
= control target key start
LH: loop header
LB: loop body
LE: loop exit
PB: predicated region body
PF: predicated region fallthrough
CT: control target
= control target key end

     0   :  { %vm34_vm0 = vcmask 64512   ;;  %v328_v0 = vmov 0.0   ;;  %vm329_vm1 = vmmov 0   ;;  %v330_v4 = vmov 0   ;;  %s403_s0 = inlined_call_operand.vmem [shape: f32[8,128], index: 0, kind: input, shape index: {}]   ;;  %s404_s1 = inlined_call_operand.vmem [shape: f32[4,8], index: 1, kind: input, shape index: {}]   ;;  %s405_s2 = inlined_call_operand.vmem [shape: f32[4,1], index: 2, kind: input, shape index: {}]   ;;  %s406_s4 = inlined_call_operand.vmem [shape: f32[8,1], index: 4, kind: input, shape index: {}]   ;;  %s407_s7 = inlined_call_operand.vmem [shape: f32[4,128], index: 7, kind: output, shape index: {1}]   ;;  %s408_s3 = inlined_call_operand.vmem [shape: f32[8,4], index: 3, kind: input, shape index: {}]   ;;  %s409_s5 = inlined_call_operand.vmem [shape: f32[1,4], index: 5, kind: input, shape index: {}]   ;;  %s410_s6 = inlined_call_operand.vmem [shape: f32[8,128], index: 6, kind: output, shape index: {0}]   ;;  %s411_s8 = inlined_call_operand.vmem [shape: s32[1,128], index: 8, kind: output, shape index: {2}]  }
   0x1   :  { %302 = vmatprep.subr.mxu0 %v328_v0  ;;  %v26_v1 = vld [vmem:[%s403_s0] sm:$0xff]  ;;  %304 = vmatprep.mubr.msk.f32.mxu0 %vm329_vm1, %v328_v0  ;;  %vm126_vm2 = vcmask 1043456   ;;  %vm122_vm3 = vcmask 31744  }
   0x2   :  { %v27_v2 = vld [vmem:[%s404_s1] sm:$0xf]  ;;  %303 = vmatpush3.msra.mxu0 %v26_v1  ;;  %323 = vset.pattern.permute.xlu0 %v330_v4 }
   0x3   :  { %v28_v3 = vld [vmem:[%s405_s2] sm:$0xf]  ;;  %305 = vmatmul.mubr.msk.f32.vlgmr.msra.gmra.mrb[0].mxu0 %vm34_vm0, %v27_v2  ;;  %307 = vmatprep.subr.mxu1 %v328_v0 }
   0x4   :  { %31 = vperm.xlu0 %323, %v28_v3   ;;  %v116_v5 = vld [vmem:[%s406_s4] sm:$0xff]  ;;  %312 = vmatprep.subr.mxu0 %v328_v0 }
   0x5   :  { %309 = vmatprep.mubr.msk.f32.mxu1 %vm329_vm1, %v328_v0  ;;  %314 = vmatprep.mubr.msk.f32.mxu0 %vm329_vm1, %v328_v0  ;;  %v115_v15 = vld [vmem:[%s408_s3] sm:$0xff] }
   0x6   :  { %v202_v16 = vld [vmem:[%s409_s5] sm:$0x1] }
   0x8   :  { %119 = vperm.xlu0 %323, %v116_v5  }
  0x83   :  { %v32_v6 = vpop.permute.xlu0 %31 }
  0x87   :  { %v120_v17 = vpop.permute.xlu0 %119 }
  0xd6   :  { %v104_v7 = vpop.f32.mrb[0].mxu0 }
  0xd7   :  { %v105_v8 = vadd.f32 %v104_v7, %v32_v6  ;;  %v306_v9 = vpop.f32.mrb[1].mxu0 }
  0xd9   :  { %v291_v10 = vmul.f32 -1.442695, %v105_v8 }
  0xdb   :  { %324 = vpow2.f32 %v291_v10 }
  0xe5   :  { %v325_v11 = vpop.eup %324 }
  0xe6   :  { %v111_v12 = vadd.f32 1.0, %v325_v11 }
  0xe8   :  { %326 = vrcp.f32 %v111_v12 }
  0xf2   :  { %v327_v13 = vpop.eup %326 }
  0xf3   :  { %201 = vst [vmem:[%s407_s7] sm:$0xf] %v327_v13  ;;  %v317_v14 = vround.rtne.f32 %v327_v13 }
  0xf5   :  { %308 = vmatpush3.msk.msra.mxu1 %vm126_vm2, %v317_v14  ;;  %313 = vmatpush3.msk.msra.mxu0 %vm126_vm2, %v317_v14 }
  0xf6   :  { %310 = vmatmul.mubr.msk.f32.vlgmr.msra.gmra.mrb[0].mxu1 %vm122_vm3, %v115_v15  ;;  %315 = vmatmul.mubr.msk.f32.vlgmr.msra.gmra.mrb[2].mxu0 %vm122_vm3, %v202_v16 }
 0x1c9   :  { %v196_v18 = vpop.f32.mrb[0].mxu1  ;;  %v272_v19 = vpop.f32.mrb[2].mxu0 }
 0x1ca   :  { %v197_v20 = vadd.f32 %v196_v18, %v120_v17  ;;  %v318_v21 = vtrunc.f32 %v272_v19  ;;  %v316_v22 = vpop.f32.mrb[3].mxu0  ;;  %v311_v23 = vpop.f32.mrb[1].mxu1 }
 0x1cc   :  { %200 = vst [vmem:[%s410_s6] sm:$0xff] %v197_v20  ;;  %v319_v24 = vcvt.f32.s32 %v318_v21 }
 0x1ce   :  { %277 = vst [vmem:[%s411_s8] sm:$0x1] %v319_v24 }

</bundles_post_ra>
